<compile_context>
chip_gen: v6e
topology: v6e:2x2x1
jax: 0.10.0
libtpu: 0.0.40
codegen_flags: <defaults>
</compile_context>

<pallas_src>
from functools import partial

import numpy as np
import jax
import jax.numpy as jnp
from jax import lax
from jax.experimental import pallas as pl
from jax.experimental.pallas import tpu as pltpu


# ----------------------------------------------------------------------------
# Pallas kernel: one batch element per grid step, channel-major (C, L) with the
# spatial axis L on lanes. All 1x1 convs are W^T @ x matmuls on the MXU.
# ----------------------------------------------------------------------------
def _resnet_single_attn_kernel(n_heads,
                               x_ref,
                               wqkv_ref, bqkv_ref,
                               wr_ref, br_ref,
                               w1_ref, b1_ref,
                               w2_ref, b2_ref,
                               wc_ref, bc_ref,
                               out_ref):
    x = x_ref[0]                                # (C, L)  channel-major, L on lanes
    C, L = x.shape
    hk = C // n_heads
    cdt = wqkv_ref.dtype                        # MXU operand dtype (f32 or bf16)

    xf = x.astype(jnp.float32)                  # residual path in f32
    xc = x.astype(cdt)

    # ---- fused 1x1-conv Q/K/V projection: one (3C, C) @ (C, L) MXU pass ------------
    qkv = jnp.dot(wqkv_ref[...], xc, preferred_element_type=jnp.float32) + bqkv_ref[...]
    q = qkv[0 * C:1 * C].reshape(n_heads, hk, L)
    k = qkv[1 * C:2 * C].reshape(n_heads, hk, L)
    v = qkv[2 * C:3 * C].reshape(n_heads, hk, L)

    # ---- EfficientAttention, all heads at once (f32 softmax) -----------------------
    # keys: softmax over the spatial axis (lanes); queries: softmax over head channels.
    k = k - jnp.max(k, axis=2, keepdims=True)
    ek = jnp.exp(k)
    k = ek / jnp.sum(ek, axis=2, keepdims=True)

    q = q - jnp.max(q, axis=1, keepdims=True)
    eq = jnp.exp(q)
    q = eq / jnp.sum(eq, axis=1, keepdims=True)

    # context[h] = K_h @ V_h^T  -> (hk, hv);  attended[h] = context[h]^T @ Q_h -> (hv, L)
    # (batched dot_general; no materialized transposes, no per-head concat)
    ctx = lax.dot_general(k.astype(cdt), v.astype(cdt),
                          dimension_numbers=(((2,), (2,)), ((0,), (0,))),
                          preferred_element_type=jnp.float32)          # (h, hk, hv)
    att = lax.dot_general(ctx.astype(cdt), q.astype(cdt),
                          dimension_numbers=(((1,), (1,)), ((0,), (0,))),
                          preferred_element_type=jnp.float32)          # (h, hv, L)
    agg = att.reshape(C, L)                     # heads back on the channel (sublane) axis

    # 1x1 reprojection + residual
    attn = (jnp.dot(wr_ref[...], agg.astype(cdt), preferred_element_type=jnp.float32)
            + br_ref[...] + xf)

    # ---- PositionwiseConv: w2(relu(w1(x))) + residual -------------------------------
    h1 = jnp.maximum(
        jnp.dot(w1_ref[...], attn.astype(cdt), preferred_element_type=jnp.float32)
        + b1_ref[...], 0.0)
    ffn = (jnp.dot(w2_ref[...], h1.astype(cdt), preferred_element_type=jnp.float32)
           + b2_ref[...] + attn)

    # ---- final grouped 1x1 Conv3d (groups=4) as a block-diagonal dense matmul --------
    # (dense form kept here: channels/groups < 128 at these sizes so a grouped/batched
    #  contraction would only pad; switch to a grouped einsum at production channel counts.)
    out = (jnp.dot(wc_ref[...], ffn.astype(cdt), preferred_element_type=jnp.float32)
           + bc_ref[...])
    out_ref[0] = out.astype(out_ref.dtype)


# ----------------------------------------------------------------------------
# Weight preparation: fold channel_shuffle(groups=2) into the weights and
# transpose them for the channel-major kernel (kernel computes W^T @ x).
# ----------------------------------------------------------------------------
def _shuffle_inverse_perm(C, groups=2):
    # channel_shuffle output channel j reads input channel src[j]; inv = argsort(src).
    j = np.arange(C)
    src = (j % groups) * (C // groups) + (j // groups)
    return np.argsort(src)


def prepare_params(params, *, compute_dtype):
    (wq, bq, wk, bk, wv, bv, wr, br, w1, b1, w2, b2, wc, bc) = params
    C = wq.shape[0]
    inv = _shuffle_inverse_perm(C)

    wdt = jnp.dtype(compute_dtype)
    t_in = lambda w: jnp.asarray(w[inv, :].T, dtype=wdt)           # input-side row permute
    col = lambda b: jnp.asarray(b.reshape(-1, 1), dtype=jnp.float32)

    wqkv = jnp.concatenate([t_in(wq), t_in(wk), t_in(wv)], axis=0)  # (3C, C)
    bqkv = jnp.concatenate([col(bq), col(bk), col(bv)], axis=0)     # (3C, 1)
    wr_t = jnp.asarray(wr[:, inv].T, dtype=wdt)                     # output-side col permute
    br_c = col(br[:, inv])
    w1_t = t_in(w1)
    b1_c = col(b1)
    w2_t = jnp.asarray(w2[:, inv].T, dtype=wdt)
    b2_c = col(b2[:, inv])
    wc_t = t_in(wc)                                                 # (channels, C)
    bc_c = col(bc)
    return (wqkv, bqkv, wr_t, br_c, w1_t, b1_c, w2_t, b2_c, wc_t, bc_c)


# ----------------------------------------------------------------------------
# Wrapper: only a free reshape outside the kernel; hot path entirely in Pallas.
# ----------------------------------------------------------------------------
def resnet_single_attn(x_fused, params, *, n_heads, compute_dtype=None):
    # x_fused: (N, ch, D, H, W) with ch = 2 * channels   (native PyTorch NCDHW-video layout)
    N, C, D, H, W = x_fused.shape
    channels = C // 2
    L = D * H * W
    cdt = jnp.dtype(compute_dtype) if compute_dtype is not None else x_fused.dtype

    # channel_shuffle is folded into the weights; only a free reshape (no HBM permute).
    x_cm = x_fused.reshape(N, C, L)
    kparams = prepare_params(params, compute_dtype=cdt)

    # Weights/biases: whole-array resident in VMEM (no per-step double-buffered DMA).
    wspec = pl.BlockSpec(memory_space=pltpu.MemorySpace.VMEM)
    kernel = partial(_resnet_single_attn_kernel, n_heads)

    out_cm = pl.pallas_call(
        kernel,
        out_shape=jax.ShapeDtypeStruct((N, channels, L), x_fused.dtype),
        grid=(N,),
        in_specs=[pl.BlockSpec((1, C, L), lambda i: (i, 0, 0))] + [wspec] * len(kparams),
        out_specs=pl.BlockSpec((1, channels, L), lambda i: (i, 0, 0)),
        compiler_params=pltpu.CompilerParams(
            dimension_semantics=("parallel",),
            vmem_limit_bytes=64 * 1024 * 1024),
    )(x_cm, *kparams)

    # TODO(synk): for production sizes (L ~ 10k-50k, ch ~ 512-1024) on v7x, add an L-tiled
    #             two-pass (online-softmax for the key axis) variant so the per-batch block
    #             does not have to fit VMEM in one piece.
    return out_cm.reshape(N, channels, D, H, W)


# ----------------------------------------------------------------------------
# Pure-JAX reference (explicit channel shuffle, tokens-major, f32) for checking.
# ----------------------------------------------------------------------------
def reference(x_fused, params, *, n_heads):
    N, C, D, H, W = x_fused.shape
    channels = C // 2
    L = D * H * W
    g = 2
    xs = x_fused.astype(jnp.float32).reshape(N, g, C // g, D, H, W)
    xs = jnp.transpose(xs, (0, 2, 1, 3, 4, 5)).reshape(N, C, D, H, W)
    x = jnp.transpose(xs.reshape(N, C, L), (0, 2, 1))      # (N, L, C), shuffled channels

    (wq, bq, wk, bk, wv, bv, wr, br, w1, b1, w2, b2, wc, bc) = params
    q = x @ wq + bq
    k = x @ wk + bk
    v = x @ wv + bv
    hk = C // n_heads
    heads = []
    for h in range(n_heads):
        kh = jax.nn.softmax(k[:, :, h * hk:(h + 1) * hk], axis=1)   # over spatial
        qh = jax.nn.softmax(q[:, :, h * hk:(h + 1) * hk], axis=2)   # over channel
        vh = v[:, :, h * hk:(h + 1) * hk]
        ctx = jnp.einsum('nlk,nlv->nkv', kh, vh)
        heads.append(jnp.einsum('nlk,nkv->nlv', qh, ctx))
    attn = jnp.concatenate(heads, axis=2) @ wr + br + x
    ffn = jnp.maximum(attn @ w1 + b1, 0.0) @ w2 + b2 + attn
    out = ffn @ wc + bc
    return jnp.transpose(out, (0, 2, 1)).reshape(N, channels, D, H, W)


# ----------------------------------------------------------------------------
# Deterministic synthetic parameters (no checkpoint loading).
# ----------------------------------------------------------------------------
def make_params(key, channels):
    ch = channels * 2
    ks = jax.random.split(key, 16)
    scale = 0.2

    def w(k, shape):
        return (scale * jax.random.normal(k, shape)).astype(jnp.float32)

    wq, wk_, wv, wr = (w(ks[i], (ch, ch)) for i in range(4))
    bq, bk_, bv, br = (w(ks[4 + i], (1, ch)) for i in range(4))
    w1, w2 = w(ks[8], (ch, ch)), w(ks[9], (ch, ch))
    b1, b2 = w(ks[10], (1, ch)), w(ks[11], (1, ch))

    # grouped 1x1 Conv3d(ch -> channels, groups=4) as a block-diagonal dense matrix
    groups = 4
    in_g, out_g = ch // groups, channels // groups
    wc = jnp.zeros((ch, channels), jnp.float32)
    for gi in range(groups):
        blk = w(jax.random.fold_in(ks[12], gi), (in_g, out_g))
        wc = wc.at[gi * in_g:(gi + 1) * in_g, gi * out_g:(gi + 1) * out_g].set(blk)
    bc = w(ks[13], (1, channels))

    return (wq, bq, wk_, bk_, wv, bv, wr, br, w1, b1, w2, b2, wc, bc)


if __name__ == "__main__":
    key = jax.random.PRNGKey(0)
    channels, n_heads = 4, 2
    N, D, H, W = 2, 4, 8, 8           # L = D*H*W = 256 (lane-dense)
    ch = channels * 2

    k_x, k_p = jax.random.split(key)
    x_fused = jax.random.normal(k_x, (N, ch, D, H, W), dtype=jnp.float32)
    params = make_params(k_p, channels)

    ref = jax.block_until_ready(reference(x_fused, params, n_heads=n_heads))

    # f32 path (compute dtype follows the input dtype)
    out = jax.block_until_ready(resnet_single_attn(x_fused, params, n_heads=n_heads))
    assert out.shape == (N, channels, D, H, W), out.shape
    assert out.dtype == x_fused.dtype
    np.testing.assert_allclose(np.asarray(out), np.asarray(ref), rtol=5e-3, atol=5e-3)

    # bf16 MXU path (f32 accumulation + f32 softmax) — looser tolerance as expected.
    out_bf16 = jax.block_until_ready(
        resnet_single_attn(x_fused.astype(jnp.bfloat16), params, n_heads=n_heads))
    np.testing.assert_allclose(np.asarray(out_bf16.astype(jnp.float32)), np.asarray(ref),
                               rtol=6e-2, atol=6e-2)

    print("KERNEL_OK")
</pallas_src>

<mosaic_0001>
module attributes {stable_mosaic.version = 11 : i64} {
  func.func @_resnet_single_attn_kernel(%arg0: i32, %arg1: memref<1x8x256xf32, #tpu.memory_space<vmem>>, %arg2: memref<24x8xf32, #tpu.memory_space<vmem>>, %arg3: memref<24x1xf32, #tpu.memory_space<vmem>>, %arg4: memref<8x8xf32, #tpu.memory_space<vmem>>, %arg5: memref<8x1xf32, #tpu.memory_space<vmem>>, %arg6: memref<8x8xf32, #tpu.memory_space<vmem>>, %arg7: memref<8x1xf32, #tpu.memory_space<vmem>>, %arg8: memref<8x8xf32, #tpu.memory_space<vmem>>, %arg9: memref<8x1xf32, #tpu.memory_space<vmem>>, %arg10: memref<4x8xf32, #tpu.memory_space<vmem>>, %arg11: memref<4x1xf32, #tpu.memory_space<vmem>>, %arg12: memref<1x4x256xf32, #tpu.memory_space<vmem>>) attributes {dimension_semantics = [#tpu.dimension_semantics<parallel>], iteration_bounds = array<i64: 2>, scalar_prefetch = 0 : i64, scratch_operands = 0 : i64, tpu.core_type = #tpu.core_type<tc>, window_params = [{transform_indices = @transform_0, window_bounds = array<i64: 1, 8, 256>}, {pipeline_mode = #tpu.pipeline_mode<synchronous>, transform_indices = @transform_1, window_bounds = array<i64: 24, 8>}, {pipeline_mode = #tpu.pipeline_mode<synchronous>, transform_indices = @transform_2, window_bounds = array<i64: 24, 1>}, {pipeline_mode = #tpu.pipeline_mode<synchronous>, transform_indices = @transform_3, window_bounds = array<i64: 8, 8>}, {pipeline_mode = #tpu.pipeline_mode<synchronous>, transform_indices = @transform_4, window_bounds = array<i64: 8, 1>}, {pipeline_mode = #tpu.pipeline_mode<synchronous>, transform_indices = @transform_5, window_bounds = array<i64: 8, 8>}, {pipeline_mode = #tpu.pipeline_mode<synchronous>, transform_indices = @transform_6, window_bounds = array<i64: 8, 1>}, {pipeline_mode = #tpu.pipeline_mode<synchronous>, transform_indices = @transform_7, window_bounds = array<i64: 8, 8>}, {pipeline_mode = #tpu.pipeline_mode<synchronous>, transform_indices = @transform_8, window_bounds = array<i64: 8, 1>}, {pipeline_mode = #tpu.pipeline_mode<synchronous>, transform_indices = @transform_9, window_bounds = array<i64: 4, 8>}, {pipeline_mode = #tpu.pipeline_mode<synchronous>, transform_indices = @transform_10, window_bounds = array<i64: 4, 1>}, {transform_indices = @transform_11, window_bounds = array<i64: 1, 4, 256>}]} {
    %c0 = arith.constant 0 : index
    %c0_0 = arith.constant 0 : index
    %c0_1 = arith.constant 0 : index
    %0 = vector.load %arg1[%c0, %c0_0, %c0_1] : memref<1x8x256xf32, #tpu.memory_space<vmem>>, vector<1x8x256xf32>
    %1 = vector.shape_cast %0 : vector<1x8x256xf32> to vector<8x256xf32>
    %c0_2 = arith.constant 0 : index
    %c0_3 = arith.constant 0 : index
    %2 = vector.load %arg2[%c0_2, %c0_3] : memref<24x8xf32, #tpu.memory_space<vmem>>, vector<24x8xf32>
    %cst = arith.constant dense<0.000000e+00> : vector<24x256xf32>
    %3 = tpu.matmul %2, %1, %cst {dimension_numbers = #tpu.dot_dimension_numbers<[1], [0], [0], [1], [0, 0, 1, 1], [], []>} : vector<24x8xf32>, vector<8x256xf32>, vector<24x256xf32> -> vector<24x256xf32>
    %c0_4 = arith.constant 0 : index
    %c0_5 = arith.constant 0 : index
    %4 = vector.load %arg3[%c0_4, %c0_5] : memref<24x1xf32, #tpu.memory_space<vmem>>, vector<24x1xf32>
    %5 = vector.broadcast %4 : vector<24x1xf32> to vector<24x256xf32>
    %6 = arith.addf %3, %5 : vector<24x256xf32>
    %7 = vector.extract_strided_slice %6 {offsets = [0, 0], sizes = [8, 256], strides = [1, 1]} : vector<24x256xf32> to vector<8x256xf32>
    %8 = vector.shape_cast %7 : vector<8x256xf32> to vector<2x4x256xf32>
    %9 = vector.extract_strided_slice %6 {offsets = [8, 0], sizes = [8, 256], strides = [1, 1]} : vector<24x256xf32> to vector<8x256xf32>
    %10 = vector.shape_cast %9 : vector<8x256xf32> to vector<2x4x256xf32>
    %11 = vector.extract_strided_slice %6 {offsets = [16, 0], sizes = [8, 256], strides = [1, 1]} : vector<24x256xf32> to vector<8x256xf32>
    %12 = vector.shape_cast %11 : vector<8x256xf32> to vector<2x4x256xf32>
    %cst_6 = arith.constant dense<0xFF800000> : vector<2x4xf32>
    %13 = vector.multi_reduction <maximumf>, %10, %cst_6 [2] : vector<2x4x256xf32> to vector<2x4xf32>
    %14 = vector.shape_cast %13 : vector<2x4xf32> to vector<2x4x1xf32>
    %15 = vector.broadcast %14 : vector<2x4x1xf32> to vector<2x4x256xf32>
    %16 = arith.subf %10, %15 : vector<2x4x256xf32>
    %17 = math.exp %16 : vector<2x4x256xf32>
    %cst_7 = arith.constant dense<0.000000e+00> : vector<2x4xf32>
    %18 = vector.multi_reduction <add>, %17, %cst_7 [2] : vector<2x4x256xf32> to vector<2x4xf32>
    %19 = vector.shape_cast %18 : vector<2x4xf32> to vector<2x4x1xf32>
    %20 = vector.broadcast %19 : vector<2x4x1xf32> to vector<2x4x256xf32>
    %21 = arith.divf %17, %20 : vector<2x4x256xf32>
    %cst_8 = arith.constant dense<0xFF800000> : vector<2x256xf32>
    %22 = vector.multi_reduction <maximumf>, %8, %cst_8 [1] : vector<2x4x256xf32> to vector<2x256xf32>
    %23 = vector.shape_cast %22 : vector<2x256xf32> to vector<2x1x256xf32>
    %24 = vector.broadcast %23 : vector<2x1x256xf32> to vector<2x4x256xf32>
    %25 = arith.subf %8, %24 : vector<2x4x256xf32>
    %26 = math.exp %25 : vector<2x4x256xf32>
    %cst_9 = arith.constant dense<0.000000e+00> : vector<2x256xf32>
    %27 = vector.multi_reduction <add>, %26, %cst_9 [1] : vector<2x4x256xf32> to vector<2x256xf32>
    %28 = vector.shape_cast %27 : vector<2x256xf32> to vector<2x1x256xf32>
    %29 = vector.broadcast %28 : vector<2x1x256xf32> to vector<2x4x256xf32>
    %30 = arith.divf %26, %29 : vector<2x4x256xf32>
    %cst_10 = arith.constant dense<0.000000e+00> : vector<2x4x4xf32>
    %31 = tpu.matmul %21, %12, %cst_10 {dimension_numbers = #tpu.dot_dimension_numbers<[2], [2], [1], [1], [0, 0, 0, 1, 1, 1], [0], [0]>} : vector<2x4x256xf32>, vector<2x4x256xf32>, vector<2x4x4xf32> -> vector<2x4x4xf32>
    %cst_11 = arith.constant dense<0.000000e+00> : vector<2x4x256xf32>
    %32 = tpu.matmul %31, %30, %cst_11 {dimension_numbers = #tpu.dot_dimension_numbers<[1], [1], [2], [2], [0, 0, 0, 2, 1, 2], [0], [0]>} : vector<2x4x4xf32>, vector<2x4x256xf32>, vector<2x4x256xf32> -> vector<2x4x256xf32>
    %33 = vector.shape_cast %32 : vector<2x4x256xf32> to vector<8x256xf32>
    %c0_12 = arith.constant 0 : index
    %c0_13 = arith.constant 0 : index
    %34 = vector.load %arg4[%c0_12, %c0_13] : memref<8x8xf32, #tpu.memory_space<vmem>>, vector<8x8xf32>
    %cst_14 = arith.constant dense<0.000000e+00> : vector<8x256xf32>
    %35 = tpu.matmul %34, %33, %cst_14 {dimension_numbers = #tpu.dot_dimension_numbers<[1], [0], [0], [1], [0, 0, 1, 1], [], []>} : vector<8x8xf32>, vector<8x256xf32>, vector<8x256xf32> -> vector<8x256xf32>
    %c0_15 = arith.constant 0 : index
    %c0_16 = arith.constant 0 : index
    %36 = vector.load %arg5[%c0_15, %c0_16] : memref<8x1xf32, #tpu.memory_space<vmem>>, vector<8x1xf32>
    %37 = vector.broadcast %36 : vector<8x1xf32> to vector<8x256xf32>
    %38 = arith.addf %35, %37 : vector<8x256xf32>
    %39 = arith.addf %38, %1 : vector<8x256xf32>
    %c0_17 = arith.constant 0 : index
    %c0_18 = arith.constant 0 : index
    %40 = vector.load %arg6[%c0_17, %c0_18] : memref<8x8xf32, #tpu.memory_space<vmem>>, vector<8x8xf32>
    %cst_19 = arith.constant dense<0.000000e+00> : vector<8x256xf32>
    %41 = tpu.matmul %40, %39, %cst_19 {dimension_numbers = #tpu.dot_dimension_numbers<[1], [0], [0], [1], [0, 0, 1, 1], [], []>} : vector<8x8xf32>, vector<8x256xf32>, vector<8x256xf32> -> vector<8x256xf32>
    %c0_20 = arith.constant 0 : index
    %c0_21 = arith.constant 0 : index
    %42 = vector.load %arg7[%c0_20, %c0_21] : memref<8x1xf32, #tpu.memory_space<vmem>>, vector<8x1xf32>
    %43 = vector.broadcast %42 : vector<8x1xf32> to vector<8x256xf32>
    %44 = arith.addf %41, %43 : vector<8x256xf32>
    %cst_22 = arith.constant 0.000000e+00 : f32
    %45 = vector.broadcast %cst_22 : f32 to vector<8x256xf32>
    %46 = arith.maximumf %44, %45 : vector<8x256xf32>
    %c0_23 = arith.constant 0 : index
    %c0_24 = arith.constant 0 : index
    %47 = vector.load %arg8[%c0_23, %c0_24] : memref<8x8xf32, #tpu.memory_space<vmem>>, vector<8x8xf32>
    %cst_25 = arith.constant dense<0.000000e+00> : vector<8x256xf32>
    %48 = tpu.matmul %47, %46, %cst_25 {dimension_numbers = #tpu.dot_dimension_numbers<[1], [0], [0], [1], [0, 0, 1, 1], [], []>} : vector<8x8xf32>, vector<8x256xf32>, vector<8x256xf32> -> vector<8x256xf32>
    %c0_26 = arith.constant 0 : index
    %c0_27 = arith.constant 0 : index
    %49 = vector.load %arg9[%c0_26, %c0_27] : memref<8x1xf32, #tpu.memory_space<vmem>>, vector<8x1xf32>
    %50 = vector.broadcast %49 : vector<8x1xf32> to vector<8x256xf32>
    %51 = arith.addf %48, %50 : vector<8x256xf32>
    %52 = arith.addf %51, %39 : vector<8x256xf32>
    %c0_28 = arith.constant 0 : index
    %c0_29 = arith.constant 0 : index
    %53 = vector.load %arg10[%c0_28, %c0_29] : memref<4x8xf32, #tpu.memory_space<vmem>>, vector<4x8xf32>
    %cst_30 = arith.constant dense<0.000000e+00> : vector<4x256xf32>
    %54 = tpu.matmul %53, %52, %cst_30 {dimension_numbers = #tpu.dot_dimension_numbers<[1], [0], [0], [1], [0, 0, 1, 1], [], []>} : vector<4x8xf32>, vector<8x256xf32>, vector<4x256xf32> -> vector<4x256xf32>
    %c0_31 = arith.constant 0 : index
    %c0_32 = arith.constant 0 : index
    %55 = vector.load %arg11[%c0_31, %c0_32] : memref<4x1xf32, #tpu.memory_space<vmem>>, vector<4x1xf32>
    %56 = vector.broadcast %55 : vector<4x1xf32> to vector<4x256xf32>
    %57 = arith.addf %54, %56 : vector<4x256xf32>
    %c0_33 = arith.constant 0 : index
    %c0_34 = arith.constant 0 : index
    %c0_35 = arith.constant 0 : index
    %58 = vector.load %arg12[%c0_33, %c0_34, %c0_35] : memref<1x4x256xf32, #tpu.memory_space<vmem>>, vector<1x4x256xf32>
    %59 = vector.shape_cast %58 : vector<1x4x256xf32> to vector<4x256xf32>
    %60 = vector.shape_cast %57 : vector<4x256xf32> to vector<1x4x256xf32>
    tpu.vector_store %arg12[%c0_33, %c0_34, %c0_35], %60 {strides = array<i32>} : memref<1x4x256xf32, #tpu.memory_space<vmem>>, vector<1x4x256xf32>,
    return
  }
  func.func @transform_0(%arg0: i32) -> (i32, i32, i32) {
    %c0_i32 = arith.constant 0 : i32
    %c0_i32_0 = arith.constant 0 : i32
    %c0_i32_1 = arith.constant 0 : i32
    return %arg0, %c0_i32, %c0_i32_0 : i32, i32, i32
  }
  func.func @transform_1(%arg0: i32) -> (i32, i32) {
    %c0_i32 = arith.constant 0 : i32
    %c0_i32_0 = arith.constant 0 : i32
    %c0_i32_1 = arith.constant 0 : i32
    return %c0_i32, %c0_i32_0 : i32, i32
  }
  func.func @transform_2(%arg0: i32) -> (i32, i32) {
    %c0_i32 = arith.constant 0 : i32
    %c0_i32_0 = arith.constant 0 : i32
    %c0_i32_1 = arith.constant 0 : i32
    return %c0_i32, %c0_i32_0 : i32, i32
  }
  func.func @transform_3(%arg0: i32) -> (i32, i32) {
    %c0_i32 = arith.constant 0 : i32
    %c0_i32_0 = arith.constant 0 : i32
    %c0_i32_1 = arith.constant 0 : i32
    return %c0_i32, %c0_i32_0 : i32, i32
  }
  func.func @transform_4(%arg0: i32) -> (i32, i32) {
    %c0_i32 = arith.constant 0 : i32
    %c0_i32_0 = arith.constant 0 : i32
    %c0_i32_1 = arith.constant 0 : i32
    return %c0_i32, %c0_i32_0 : i32, i32
  }
  func.func @transform_5(%arg0: i32) -> (i32, i32) {
    %c0_i32 = arith.constant 0 : i32
    %c0_i32_0 = arith.constant 0 : i32
    %c0_i32_1 = arith.constant 0 : i32
    return %c0_i32, %c0_i32_0 : i32, i32
  }
  func.func @transform_6(%arg0: i32) -> (i32, i32) {
    %c0_i32 = arith.constant 0 : i32
    %c0_i32_0 = arith.constant 0 : i32
    %c0_i32_1 = arith.constant 0 : i32
    return %c0_i32, %c0_i32_0 : i32, i32
  }
  func.func @transform_7(%arg0: i32) -> (i32, i32) {
    %c0_i32 = arith.constant 0 : i32
    %c0_i32_0 = arith.constant 0 : i32
    %c0_i32_1 = arith.constant 0 : i32
    return %c0_i32, %c0_i32_0 : i32, i32
  }
  func.func @transform_8(%arg0: i32) -> (i32, i32) {
    %c0_i32 = arith.constant 0 : i32
    %c0_i32_0 = arith.constant 0 : i32
    %c0_i32_1 = arith.constant 0 : i32
    return %c0_i32, %c0_i32_0 : i32, i32
  }
  func.func @transform_9(%arg0: i32) -> (i32, i32) {
    %c0_i32 = arith.constant 0 : i32
    %c0_i32_0 = arith.constant 0 : i32
    %c0_i32_1 = arith.constant 0 : i32
    return %c0_i32, %c0_i32_0 : i32, i32
  }
  func.func @transform_10(%arg0: i32) -> (i32, i32) {
    %c0_i32 = arith.constant 0 : i32
    %c0_i32_0 = arith.constant 0 : i32
    %c0_i32_1 = arith.constant 0 : i32
    return %c0_i32, %c0_i32_0 : i32, i32
  }
  func.func @transform_11(%arg0: i32) -> (i32, i32, i32) {
    %c0_i32 = arith.constant 0 : i32
    %c0_i32_0 = arith.constant 0 : i32
    %c0_i32_1 = arith.constant 0 : i32
    return %arg0, %c0_i32, %c0_i32_0 : i32, i32, i32
  }
}

</mosaic_0001>

<bundles_post_ra>
// kernel: tpu_custom_call.1
= control target key start
LH: loop header
LB: loop body
LE: loop exit
PB: predicated region body
PF: predicated region fallthrough
CT: control target
= control target key end

     0   :  { %s1882_s0 = inlined_call_operand.vmem [shape: f32[2,8,256], index: 0, kind: input, shape index: {}]   ;;  %s1883_s1 = inlined_call_operand.vmem [shape: f32[24,8], index: 1, kind: input, shape index: {}]   ;;  %s1884_s2 = inlined_call_operand.vmem [shape: f32[24,1], index: 2, kind: input, shape index: {}]   ;;  %s1885_s3 = inlined_call_operand.vmem [shape: f32[8,8], index: 3, kind: input, shape index: {}]   ;;  %s1886_s4 = inlined_call_operand.vmem [shape: f32[8,1], index: 4, kind: input, shape index: {}]   ;;  %s1887_s5 = inlined_call_operand.vmem [shape: f32[8,8], index: 5, kind: input, shape index: {}]   ;;  %s1888_s6 = inlined_call_operand.vmem [shape: f32[8,1], index: 6, kind: input, shape index: {}]   ;;  %s1889_s7 = inlined_call_operand.vmem [shape: f32[8,8], index: 7, kind: input, shape index: {}]   ;;  %s1890_s8 = inlined_call_operand.vmem [shape: f32[8,1], index: 8, kind: input, shape index: {}]   ;;  %s1891_s9 = inlined_call_operand.vmem [shape: f32[4,8], index: 9, kind: input, shape index: {}]   ;;  %s1892_s10 = inlined_call_operand.vmem [shape: f32[4,1], index: 10, kind: input, shape index: {}]   ;;  %s1893_s11 = inlined_call_operand.hbm [shape: f32[2,4,256], index: 11, kind: output, shape index: {}]  }
   0x1   :  { %1894 = sst [smem:[#allocation5_spill]] %s1882_s0 }
   0x2   :  { %1895 = sst [smem:[#allocation6_spill]] %s1883_s1 }
   0x3   :  { %16 = vsyncpa [#allocation3], 0 }
   0x4   :  { %18 = vsyncpa [#allocation3 + $0x1], 0  ;;  %s1703_s17 = smov 0   ;;  %s1705_s18 = smov 0  }
   0x5   :  { %s1707_s19 = smov 0   ;;  %s1709_s20 = smov 0  }
   0x6 LB: > { %s1724_s21 = sadd.s32 4294967295, %s1637_s20   ;;  %s1482_s22 = sadd.s32 4294967294, %s1637_s20   ;;  %s1637_s20 = sphi %s1709_s20, %s1903_s20   ;;  %s1633_s19 = sphi %s1707_s19, %s1902_s19   ;;  %s1629_s18 = sphi %s1705_s18, %s1901_s18   ;;  %s1625_s17 = sphi %s1703_s17, %s1900_s17  }
   0x7   : > { %s1728_s23 = sadd.s32 1, %s1637_s20   ;;  %s267_s24 = sadd.s32 1, %s1633_s19 }
   0x8   : > { %s264_s25 = ssub.s32 %s1637_s20, %s1728_s23  ;;  %p277_p0 = scmp.ne.s32.totalorder %s1633_s19, %s1629_s18 }
   0x9   : > { %p265_p1 = scmp.eq.s32.totalorder %s264_s25, 0  ;;  %p278_p2 = scmp.eq.s32.totalorder %s1724_s21, 1 }
   0xa   : > { %p283_p3 = scmp.ne.s32.totalorder %s1629_s18, %s1625_s17  ;;  %p284_p4 = scmp.eq.s32.totalorder %s1482_s22, 1 }
   0xb   : > { %s1739_s26 = scalar_select %p265_p1, %s1633_s19, %s267_s24  }
   0xc   : > { %p1741_p5 = por %p278_p2, %p277_p0  ;;  %p1745_p6 = por %p284_p4, %p283_p3 }
   0xd   : > { %p1485_p7 = scmp.ge.s32.totalorder %s1637_s20, 1  ;;  %p340_p8 = scmp.lt.s32.totalorder %s1637_s20, 3 }
   0xf   : > { %p341_p9 = pnand %p1485_p7, %p340_p8 }
  0x10   : > { %p380_p10 = scmp.lt.s32.totalorder (!%p341_p9), %s1724_s21, 1  ;;  %s1898_s0 = sld [smem:[#allocation5_spill]] (!%p341_p9) }
  0x11   : > { %344 = sbr.rel (%p341_p9) target bundleno = 1896 (0x768), region = 64  ;;  %s1899_s1 = sld [smem:[#allocation6_spill]] (!%p341_p9) }
  0x12   : > { %s1516_s15 = sshll.u32 (!%p341_p9), %s1724_s21, 7 }
  0x13   : > { %s1421_s29 = scalar_lea.hbm (!%p341_p9), %s1893_s11, %s1516_s15 }
  0x16   : > { %v1639_v0 = vmov 0.0   ;;  %v1640_v1 = vmov 0   ;;  %v391_v2 = vld [vmem:[%s1884_s2 + $0x8] sm:$0xff]  ;;  %s381_s12 = scalar_select %p380_p10, %s1724_s21, 1  ;;  %vm408_vm0 = vcmask 64512   ;;  %vm523_vm1 = vcmask 1043456  }
  0x17   : > { %482 = vmatprep.mubr.f32.mxu0 %v1639_v0  ;;  %1559 = vset.pattern.permute.xlu0 %v1640_v1  ;;  %v387_v5 = vld [vmem:[%s1899_s1] sm:$0xff]  ;;  %v388_v6 = vld [vmem:[%s1899_s1 + $0x8] sm:$0xff]  ;;  %v389_v7 = vld [vmem:[%s1899_s1 + $0x10] sm:$0xff]  ;;  %v1641_v25 = vmov 839922192   ;;  %v539_v27 = vlaneseq  ;;  %vm872_vm2 = vcmask 31744  }
  0x18   : > { %400 = vperm.xlu0 %1559, %v391_v2   ;;  %1560 = vset.pattern.permute.xlu1 %v1640_v1  ;;  %s1515_s13 = sshll.u32 %s381_s12, 4  ;;  %v537_v26 = vunpack.c.l.s4 %v1641_v25  ;;  %v392_v49 = vld [vmem:[%s1884_s2 + $0x10] sm:$0xff]  ;;  %v390_v50 = vld [vmem:[%s1884_s2] sm:$0xff] }
  0x19   : > { %s384_s16 = scalar_lea.vmem %s1898_s0, %s1515_s13  ;;  %v540_v29 = vshrl.u32 %v539_v27, 7  ;;  %s377_s13 = sand.u32 1, %s1629_s18  }
  0x1a   : > { %v1760_v3 = vld [vmem:[%s384_s16 + $0x8] sm:$0xff]  ;;  %v1762_v4 = vld [vmem:[%s384_s16] sm:$0xff]  ;;  %v538_v28 = vunpack.c.0.s8 %v537_v26  ;;  %s1486_s14 = sshll.u32 %s377_s13, 3  ;;  %s1409_s30 = scalar_lea.sflag [#allocation3], %s377_s13 }
  0x1b   : > { %448 = vmatprep.subr.mxu0 %v1760_v3  ;;  %s379_s16 = scalar_lea.vmem [#allocation2], %s1486_s14  ;;  %s1642_s0 = smov [#allocation2]  }
  0x1c   : > { %449 = vmatpush1.msra.mxu0 %v1762_v4  ;;  %v541_v30 = vsub.s32 %v538_v28, %v540_v29  ;;  %s1423_s22 = sshll.u32 %s379_s16, 4  ;;  %s1581_s1 = sshll.u32 %s1642_s0, 4  ;;  %s1424_s22 = int_to_ptr.vmem [resolvable:$true] %s1423_s22  ;;  %s1582_s1 = int_to_ptr.vmem [resolvable:$false] %s1581_s1 }
  0x1d   : > { %1489 = vmatmul.mubr.msk.f32.vlgmr.msra.gmra.mxu0 %vm408_vm0, %v387_v5  ;;  %s1577_s12 = scalar_lea.vmem %s1424_s22, 128  ;;  %s1583_s21 = scalar_lea.vmem %s1582_s1, 256 }
  0x1e   : > { %488 = vmatprep.mubr.f32.mxu0 %v1639_v0  ;;  %p1578_p11 = scmp.ne.s32.totalorder %s1424_s22, %s1577_s12  ;;  %p1584_p0 = scmp.lt.s32.totalorder %s1424_s22, %s1582_s1 }
  0x1f   : > { %p1585_p1 = scmp.lt.s32.totalorder %s1583_s21, %s1577_s12 }
  0x20   : > { %p1579_p12 = pnand %p1578_p11, %p1741_p5 }
  0x21   : > { %1490 = vmatmul.mubr.msk.f32.gmra.mxu0 %vm408_vm0, %v388_v6  ;;  %p1586_p2 = por %p1585_p1, %p1584_p0 }
  0x22   : > { %494 = vmatprep.mubr.f32.mxu0 %v1639_v0  ;;  %p1580_p13 = pneg %p1579_p12 }
  0x24   : > { %p1587_p3 = pnand %p1586_p2, %p1580_p13 }
  0x25   : > { %1491 = vmatmul.mubr.msk.f32.gmra.mxu0 %vm408_vm0, %v389_v7 }
  0x26   : > { %1056 = vmatprep.mubr.f32.mxu0 %v1639_v0 }
  0x93   : > { %v401_v10 = vpop.permute.xlu0 %400 }
  0xdd   : > { %v1781_v8 = vpop.f32.mrf.mxu0 }
  0xdf   : > { %v1783_v9 = vpop.f32.mrf.mxu0 }
  0xe1   : > { %v490_v11 = vpop.f32.mrf.mxu0 }
  0xe2   : > { %v491_v13 = vadd.f32 %v490_v11, %v401_v10 }
  0xe3   : > { %v492_v12 = vpop.f32.mrf.mxu0 }
  0xe4   : > { %v493_v14 = vadd.f32 %v492_v12, %v401_v10 }
  0xe5   : > { %v496_v53 = vpop.f32.mrf.mxu0 }
  0xe6   : > { %v510_v15 = vcombine.high %v491_v13, %v493_v14  ;;  %v1493_v16 = vcombine.high %v493_v14, %v493_v14  ;;  %v509_v17 = vcombine.low %v491_v13, %v493_v14  ;;  %v1492_v18 = vcombine.low %v493_v14, %v493_v14 }
  0xe7   : > { %v498_v56 = vpop.f32.mrf.mxu0 }
  0xe8   : > { %v529_v19 = vsel %vm523_vm1, %v510_v15, -inf  ;;  %v530_v20 = vsel %vm523_vm1, %v1493_v16, -inf  ;;  %v524_v21 = vsel %vm523_vm1, %v509_v17, -inf  ;;  %v525_v22 = vsel %vm523_vm1, %v1492_v18, -inf }
  0xe9   : > { %v531_v23 = vmax.f32 %v529_v19, %v530_v20  ;;  %v526_v24 = vmax.f32 %v524_v21, %v525_v22 }
  0xeb   : > { %532 = vmax.xlane.f32.xlu1 %v531_v23  ;;  %527 = vmax.xlane.f32.xlu0 %v526_v24 }
 0x174   : > { %v533_v31 = vpop.xlane.xlu1 %532  ;;  %v528_v32 = vpop.xlane.xlu0 %527 }
 0x175   : > { %v549_v33 = vrot.slane %v533_v31, %v541_v30  ;;  %v542_v34 = vrot.slane %v528_v32, %v541_v30 }
 0x177   : > { %v553_v35 = vsub.f32 %v510_v15, %v549_v33  ;;  %v552_v36 = vsub.f32 %v509_v17, %v542_v34 }
 0x179   : > { %v556_v37 = vmul.f32 1.442695, %v553_v35  ;;  %v554_v38 = vmul.f32 1.442695, %v552_v36 }
 0x17b   : > { %1561 = vpow2.f32 %v556_v37 }
 0x17c   : > { %1563 = vpow2.f32 %v554_v38 }
 0x188   : > { %v1562_v39 = vpop.eup %1561 }
 0x189   : > { %v1564_v40 = vpop.eup %1563  ;;  %v561_v42 = vcombine.high %v1562_v39, %v1562_v39  ;;  %v569_v47 = vsel %vm523_vm1, %v1562_v39, 0.0 }
 0x18a   : > { %v560_v41 = vcombine.high %v1564_v40, %v1564_v40  ;;  %v564_v43 = vsel %vm523_vm1, %v1564_v40, 0.0 }
 0x18b   : > { %v570_v46 = vsel %vm523_vm1, %v561_v42, 0.0 }
 0x18c   : > { %v565_v44 = vsel %vm523_vm1, %v560_v41, 0.0  ;;  %v571_v48 = vadd.f32 %v570_v46, %v569_v47 }
 0x18d   : > { %v566_v45 = vadd.f32 %v565_v44, %v564_v43 }
 0x18f   : > { %567 = vadd.xlane.f32.xlu1 %v566_v45 }
 0x193   : > { %572 = vadd.xlane.f32.xlu1 %v571_v48 }
 0x1a4   : > { %405 = vperm.xlu1 %1560, %v392_v49  }
 0x1a8   : > { %395 = vperm.xlu1 %1560, %v390_v50  }
 0x218   : > { %v568_v51 = vpop.xlane.xlu1 %567 }
 0x219   : > { %v582_v52 = vrot.slane %v568_v51, %v541_v30 }
 0x21b   : > { %1565 = vrcp.f32 %v582_v52 }
 0x21c   : > { %v573_v54 = vpop.xlane.xlu1 %572 }
 0x21d   : > { %v589_v55 = vrot.slane %v573_v54, %v541_v30 }
 0x21f   : > { %1567 = vrcp.f32 %v589_v55 }
 0x220   : > { %v406_v57 = vpop.permute.xlu1 %405 }
 0x221   : > { %v497_v58 = vadd.f32 %v496_v53, %v406_v57  ;;  %v499_v59 = vadd.f32 %v498_v56, %v406_v57 }
 0x223   : > { %v1496_v60 = vcombine.low %v499_v59, %v499_v59  ;;  %v515_v61 = vcombine.low %v497_v58, %v499_v59  ;;  %v1497_v62 = vcombine.high %v499_v59, %v499_v59  ;;  %v516_v30 = vcombine.high %v497_v58, %v499_v59 }
 0x224   : > { %v396_v63 = vpop.permute.xlu1 %395 }
 0x225   : > { %v485_v1 = vadd.f32 %v1781_v8, %v396_v63  ;;  %v487_v2 = vadd.f32 %v1783_v9, %v396_v63  ;;  %723 = vmatprep.subr.mxu1 %v1496_v60 }
 0x226   : > { %724 = vmatpush1.xpose.msra.mxu1 %v515_v61 }
 0x227   : > { %v503_v5 = vcombine.low %v485_v1, %v487_v2  ;;  %v504_v6 = vcombine.high %v485_v1, %v487_v2  ;;  %v1494_v7 = vcombine.low %v487_v2, %v487_v2  ;;  %v1495_v10 = vcombine.high %v487_v2, %v487_v2  ;;  %798 = vmatprep.subr.mxu1 %v1497_v62 }
 0x228   : > { %v1566_v11 = vpop.eup %1565 }
 0x229   : > { %v600_v12 = vsel %vm523_vm1, %v503_v5, -inf  ;;  %v607_v13 = vsel %vm523_vm1, %v1494_v7, -inf  ;;  %v614_v14 = vsel %vm523_vm1, %v504_v6, -inf  ;;  %v621_v15 = vsel %vm523_vm1, %v1495_v10, -inf }
 0x22a   : > { %v601_v16 = vrot.slane %v600_v12, 4  ;;  %v608_v8 = vrot.slane %v607_v13, 4  ;;  %v615_v17 = vrot.slane %v614_v14, 4  ;;  %v622_v9 = vrot.slane %v621_v15, 4 }
 0x22b   : > { %v593_v18 = vmul.f32 %v1566_v11, %v1564_v40 }
 0x22c   : > { %v1568_v19 = vpop.eup %1567  ;;  %v602_v20 = vmax.f32 %v600_v12, %v601_v16  ;;  %v609_v21 = vmax.f32 %v607_v13, %v608_v8  ;;  %v616_v22 = vmax.f32 %v614_v14, %v615_v17  ;;  %v623_v23 = vmax.f32 %v621_v15, %v622_v9 }
 0x22d   : > { %v689_v24 = vcombine.high %v593_v18, %v593_v18  ;;  %v595_v25 = vmul.f32 %v1568_v19, %v1562_v39 }
 0x22e   : > { %v603_v26 = vrot.slane %v602_v20, 2  ;;  %v610_v27 = vrot.slane %v609_v21, 2  ;;  %v617_v28 = vrot.slane %v616_v22, 2  ;;  %v624_v29 = vrot.slane %v623_v23, 2 }
 0x22f   : > { %757 = vmatprep.mubr.f32.mxu1 %v689_v24  ;;  %v764_v31 = vcombine.high %v595_v25, %v595_v25 }
 0x230   : > { %v604_v32 = vmax.f32 %v602_v20, %v603_v26  ;;  %v611_v33 = vmax.f32 %v609_v21, %v610_v27  ;;  %v618_v34 = vmax.f32 %v616_v22, %v617_v28  ;;  %v625_v35 = vmax.f32 %v623_v23, %v624_v29  ;;  %758 = vmatmul.mubr.f32.vlgmr.msra.gmra.mxu1 %v593_v18 }
 0x231   : > { %799 = vmatpush1.xpose.msra.mxu1 %v516_v30  ;;  %832 = vmatprep.mubr.f32.mxu1 %v764_v31 }
 0x232   : > { %v605_v36 = vrot.slane %v604_v32, 1  ;;  %v612_v37 = vrot.slane %v611_v33, 1  ;;  %v619_v38 = vrot.slane %v618_v34, 1  ;;  %v626_v40 = vrot.slane %v625_v35, 1 }
 0x234   : > { %v606_v41 = vmax.f32 %v604_v32, %v605_v36  ;;  %v613_v39 = vmax.f32 %v611_v33, %v612_v37  ;;  %v620_v42 = vmax.f32 %v618_v34, %v619_v38  ;;  %v627_v43 = vmax.f32 %v625_v35, %v626_v40  ;;  %833 = vmatmul.mubr.f32.vlgmr.msra.gmra.mxu1 %v595_v25  ;;  %v1070_v33 = vld [vmem:[%s1886_s4] sm:$0xff] }
 0x235   : > { %944 = vmatprep.mubr.f32.mxu1 %v1639_v0  ;;  %v1240_v34 = vld [vmem:[%s1890_s8] sm:$0xff] }
 0x236   : > { %v632_v44 = vcombine.low %v606_v41, %v613_v39  ;;  %v633_v45 = vcombine.low %v620_v42, %v627_v43  ;;  %v1323_v35 = vld [vmem:[%s1892_s10] sm:$0xf] }
 0x237   : > { %v1157_v36 = vld [vmem:[%s1888_s6] sm:$0xff] }
 0x238   : > { %v636_v46 = vsub.f32 %v503_v5, %v632_v44  ;;  %v637_v47 = vsub.f32 %v504_v6, %v633_v45  ;;  %v1069_v45 = vld [vmem:[%s1885_s3] sm:$0xff] }
 0x23a   : > { %v638_v48 = vmul.f32 1.442695, %v636_v46  ;;  %v640_v49 = vmul.f32 1.442695, %v637_v47 }
 0x23c   : > { %1569 = vpow2.f32 %v638_v48 }
 0x23d   : > { %1571 = vpow2.f32 %v640_v49 }
 0x249   : > { %v1570_v50 = vpop.eup %1569 }
 0x24a   : > { %v1572_v51 = vpop.eup %1571  ;;  %v644_v52 = vcombine.high %v1570_v50, %v1570_v50  ;;  %v648_v53 = vsel %vm523_vm1, %v1570_v50, 0.0 }
 0x24b   : > { %v649_v54 = vrot.slane %v648_v53, 4  ;;  %v645_v55 = vcombine.high %v1572_v51, %v1572_v51  ;;  %v662_v56 = vsel %vm523_vm1, %v1572_v51, 0.0 }
 0x24c   : > { %v655_v57 = vsel %vm523_vm1, %v644_v52, 0.0  ;;  %v663_v58 = vrot.slane %v662_v56, 4 }
 0x24d   : > { %v650_v59 = vadd.f32 %v649_v54, %v648_v53  ;;  %v656_v60 = vrot.slane %v655_v57, 4  ;;  %v669_v61 = vsel %vm523_vm1, %v645_v55, 0.0  ;;  %v1156_v53 = vld [vmem:[%s1887_s5] sm:$0xff] }
 0x24e   : > { %v664_v62 = vadd.f32 %v663_v58, %v662_v56  ;;  %v670_v63 = vrot.slane %v669_v61, 4 }
 0x24f   : > { %v651_v1 = vrot.slane %v650_v59, 2  ;;  %v657_v2 = vadd.f32 %v656_v60, %v655_v57 }
 0x250   : > { %v665_v5 = vrot.slane %v664_v62, 2  ;;  %v671_v6 = vadd.f32 %v670_v63, %v669_v61 }
 0x251   : > { %v652_v7 = vadd.f32 %v651_v1, %v650_v59  ;;  %v658_v10 = vrot.slane %v657_v2, 2 }
 0x252   : > { %v666_v11 = vadd.f32 %v665_v5, %v664_v62  ;;  %v672_v12 = vrot.slane %v671_v6, 2  ;;  %v1322_v5 = vld [vmem:[%s1891_s9] sm:$0xf] }
 0x253   : > { %v653_v13 = vrot.slane %v652_v7, 1  ;;  %v659_v14 = vadd.f32 %v658_v10, %v657_v2 }
 0x254   : > { %v667_v15 = vrot.slane %v666_v11, 1  ;;  %v673_v16 = vadd.f32 %v672_v12, %v671_v6 }
 0x255   : > { %v660_v8 = vrot.slane %v659_v14, 1  ;;  %v654_v9 = vadd.f32 %v653_v13, %v652_v7 }
 0x256   : > { %v674_v17 = vrot.slane %v673_v16, 1  ;;  %v668_v19 = vadd.f32 %v667_v15, %v666_v11 }
 0x257   : > { %v661_v18 = vadd.f32 %v660_v8, %v659_v14 }
 0x258   : > { %v675_v20 = vadd.f32 %v674_v17, %v673_v16 }
 0x259   : > { %v680_v21 = vcombine.low %v654_v9, %v661_v18 }
 0x25a   : > { %v681_v22 = vcombine.low %v668_v19, %v675_v20 }
 0x25b   : > { %1573 = vrcp.f32 %v680_v21 }
 0x25c   : > { %1575 = vrcp.f32 %v681_v22 }
 0x268   : > { %v1574_v23 = vpop.eup %1573 }
 0x269   : > { %v1576_v24 = vpop.eup %1575  ;;  %v685_v25 = vmul.f32 %v1574_v23, %v1570_v50 }
 0x26a   : > { %v687_v26 = vmul.f32 %v1576_v24, %v1572_v51 }
 0x26b   : > { %v871_v27 = vcombine.high %v685_v25, %v685_v25 }
 0x26c   : > { %v984_v28 = vcombine.high %v687_v26, %v687_v26 }
 0x26d   : > { %1498 = vmatprep.subr.msk.mxu1 %vm523_vm1, %v871_v27 }
 0x26e   : > { %1501 = vmatprep.subr.msk.mxu0 %vm523_vm1, %v984_v28  ;;  %1499 = vmatpush1.msk.msra.mxu1 %vm523_vm1, %v685_v25 }
 0x26f   : > { %1502 = vmatpush1.msk.msra.mxu0 %vm523_vm1, %v687_v26 }
 0x2f0   : > { %v759_v29 = vpop.f32.mrf.mxu1 }
 0x2f1   : > { %838 = vxpose.xlu1.b32.start.end [1/1] (short) (narrow) %v759_v29, 8 }
 0x2f2   : > { %v761_v30 = vpop.f32.mrf.mxu1 }
 0x2f4   : > { %v834_v31 = vpop.f32.mrf.mxu1 }
 0x2f5   : > { %951 = vxpose.xlu0.b32.start.end [1/1] (short) (narrow) %v834_v31, 8 }
 0x2f6   : > { %v836_v32 = vpop.f32.mrf.mxu1 }
 0x30f   : > { %1073 = vperm.xlu1 %1560, %v1070_v33  }
 0x313   : > { %1243 = vperm.xlu1 %1560, %v1240_v34  }
 0x317   : > { %1326 = vperm.xlu1 %1560, %v1323_v35  }
 0x31e   : > { %1160 = vperm.xlu0 %1559, %v1157_v36  }
 0x36d   : > { %v854_v37 = vpop.trf.xlu1 }
 0x36e   : > { %1500 = vmatmul.mubr.msk.f32.vlgmr.msra.gmra.mxu1 %vm872_vm2, %v854_v37 }
 0x36f   : > { %1147 = vmatprep.mubr.f32.mxu1 %v1639_v0 }
 0x371   : > { %v967_v38 = vpop.trf.xlu0 }
 0x372   : > { %1503 = vmatmul.mubr.msk.f32.vlgmr.msra.gmra.mxu0 %vm872_vm2, %v967_v38 }
 0x373   : > { %1230 = vmatprep.mubr.f32.mxu0 %v1639_v0 }
 0x38a   : > { %v1074_v47 = vpop.permute.xlu1 %1073 }
 0x38e   : > { %v1244_v61 = vpop.permute.xlu1 %1243 }
 0x392   : > { %v1327_v7 = vpop.permute.xlu1 %1326 }
 0x399   : > { %v1161_v55 = vpop.permute.xlu0 %1160 }
 0x42e   : > { %v946_v40 = vpop.f32.mrf.mxu1 }
 0x430   : > { %v948_v39 = vpop.f32.mrf.mxu1 }
 0x432   : > { %v1058_v41 = vpop.f32.mrf.mxu0 }
 0x433   : > { %v1504_v44 = vcombine.low %v946_v40, %v1058_v41 }
 0x434   : > { %v1060_v42 = vpop.f32.mrf.mxu0 }
 0x435   : > { %v1505_v43 = vcombine.low %v948_v39, %v1060_v42 }
 0x437   : > { %1113 = vmatprep.subr.mxu1 %v1505_v43 }
 0x438   : > { %1114 = vmatpush1.msra.mxu1 %v1504_v44 }
 0x439   : > { %1506 = vmatmul.mubr.msk.f32.vlgmr.msra.gmra.mxu1 %vm408_vm0, %v1069_v45 }
 0x43a   : > { %1313 = vmatprep.mubr.f32.mxu1 %v1639_v0 }
 0x4f9   : > { %v1149_v46 = vpop.f32.mrf.mxu1 }
 0x4fa   : > { %v1150_v48 = vadd.f32 %v1149_v46, %v1074_v47 }
 0x4fb   : > { %v1151_v49 = vpop.f32.mrf.mxu1 }
 0x4fc   : > { %v1152_v50 = vadd.f32 %v1151_v49, %v1074_v47  ;;  %v1154_v52 = vadd.f32 %v1150_v48, %v1762_v4 }
 0x4fe   : > { %v1155_v51 = vadd.f32 %v1152_v50, %v1760_v3  ;;  %v1239_v3 = vld [vmem:[%s1889_s7] sm:$0xff] }
 0x500   : > { %1196 = vmatprep.subr.mxu0 %v1155_v51 }
 0x501   : > { %1197 = vmatpush1.msra.mxu0 %v1154_v52 }
 0x502   : > { %1507 = vmatmul.mubr.msk.f32.vlgmr.msra.gmra.mxu0 %vm408_vm0, %v1156_v53 }
 0x503   : > { %1396 = vmatprep.mubr.f32.mxu0 %v1639_v0 }
 0x5c2   : > { %v1232_v54 = vpop.f32.mrf.mxu0 }
 0x5c3   : > { %v1233_v56 = vadd.f32 %v1232_v54, %v1161_v55 }
 0x5c4   : > { %v1234_v57 = vpop.f32.mrf.mxu0 }
 0x5c5   : > { %v1235_v58 = vadd.f32 %v1234_v57, %v1161_v55  ;;  %v1237_v60 = vmax.f32 %v1233_v56, 0.0 }
 0x5c7   : > { %v1238_v59 = vmax.f32 %v1235_v58, 0.0 }
 0x5c9   : > { %1279 = vmatprep.subr.mxu1 %v1238_v59 }
 0x5ca   : > { %1280 = vmatpush1.msra.mxu1 %v1237_v60 }
 0x5cb   : > { %1508 = vmatmul.mubr.msk.f32.vlgmr.msra.gmra.mxu1 %vm408_vm0, %v1239_v3 }
 0x68b   : > { %v1315_v4 = vpop.f32.mrf.mxu1 }
 0x68c   : > { %v1316_v0 = vadd.f32 %v1315_v4, %v1244_v61 }
 0x68d   : > { %v1317_v62 = vpop.f32.mrf.mxu1 }
 0x68e   : > { %v1318_v63 = vadd.f32 %v1317_v62, %v1244_v61  ;;  %v1320_v2 = vadd.f32 %v1316_v0, %v1154_v52 }
 0x690   : > { %v1321_v1 = vadd.f32 %v1318_v63, %v1155_v51 }
 0x692   : > { %1362 = vmatprep.subr.mxu0 %v1321_v1 }
 0x693   : > { %1363 = vmatpush1.msra.mxu0 %v1320_v2 }
 0x694   : > { %1509 = vmatmul.mubr.msk.f32.vlgmr.msra.gmra.mxu0 %vm408_vm0, %v1322_v5 }
 0x754   : > { %v1398_v6 = vpop.f32.mrf.mxu0 }
 0x755   : > { %v1399_v11 = vadd.f32 %v1398_v6, %v1327_v7 }
 0x756   : > { %v1400_v10 = vpop.f32.mrf.mxu0 }
 0x757   : > { %v1401_v12 = vadd.f32 %v1400_v10, %v1327_v7 }
 0x759   : > { %v1405_v13 = vcombine.low %v1399_v11, %v1401_v12 }
 0x75b   : > { %1407 = vst [vmem:[%s379_s16] sm:$0xff] %v1405_v13 }
 0x75c   : > { %1590 = shalt.err (!%p1587_p3)
}
 0x75d   : > { %s1591_s14 = scalar_lea.hbm %s1421_s29, 128  ;;  %s1595_s16 = scalar_lea.hbm %s1893_s11, 256 }
 0x75e   : > { %p1592_p4 = scmp.ne.s32.totalorder %s1421_s29, %s1591_s14  ;;  %p1596_p9 = scmp.lt.s32.totalorder %s1421_s29, %s1893_s11 }
 0x75f   : > { %p1597_p10 = scmp.lt.s32.totalorder %s1595_s16, %s1591_s14 }
 0x760   : > { %p1593_p7 = pnand %p1592_p4, %p1741_p5 }
 0x761   : > { %p1598_p11 = por %p1597_p10, %p1596_p9 }
 0x762   : > { %p1594_p8 = pneg %p1593_p7 }
 0x764   : > { %p1599_p12 = pnand %p1598_p11, %p1594_p8 }
 0x766   : > { %1602 = shalt.err (!%p1599_p12)
}
 0x767   : > { %1517 = dma.vmem_to_hbm [thread:$0]  (%p1741_p5), %s1424_s22, 128, %s1421_s29, %s1409_s30  }
 0x768 PF: > { %p1523_p13 = scmp.ge.s32.totalorder %s1637_s20, 2  ;;  %s1435_s0 = sand.u32 1, %s1625_s17  }
 0x769   : > { %s1436_s1 = scalar_lea.sflag [#allocation3], %s1435_s0 }
 0x76a   : > { %p1520_p0 = pnand %p1523_p13, %p1745_p6 }
 0x76c   : > { %p1521_p1 = pneg %p1520_p0 }
 0x76e   : > { %1620 = dma.done.wait (%p1521_p1), %s1436_s1, 128  }
 0x76f   : > { %1622 = vsyncadd (%p1521_p1), %s1436_s1, 4294967168  ;;  %p21_p2 = scmp.ge.s32.totalorder %s1728_s23, 4   ;;  %s1900_s17 = smov %s1629_s18 }
 0x770   : > { %s1901_s18 = smov %s1633_s19  ;;  %s1902_s19 = smov %s1739_s26 }
 0x771   : > { %s1903_s20 = smov %s1728_s23  ;;  %23 = sbr.rel (!%p21_p2) target bundleno = 6 (0x6), region = 99 }
 0x776   :  { %1441 = vsyncpa [#allocation3], 1 }
 0x777   :  { %1443 = vsyncpa [#allocation3 + $0x1], 1 }

</bundles_post_ra>
